<compile_context>
chip_gen: v6e
topology: v6e:2x2x1
jax: 0.10.0
libtpu: 0.0.40
codegen_flags: <defaults>
</compile_context>

<pallas_src>
import functools
import math

import jax
import jax.numpy as jnp
from jax.experimental import pallas as pl
from jax.experimental.pallas import tpu as pltpu

LANE = 128

_COMPILER_PARAMS = pltpu.CompilerParams(
    dimension_semantics=("parallel", "arbitrary"),   # row tiles parallel, K reduction arbitrary
    vmem_limit_bytes=32 * 1024 * 1024,               # safe on v7x (64 MiB) and v5e/v6e (128 MiB)
)


def _round_up(x, m):
    return ((x + m - 1) // m) * m


# ----------------------------- kernels --------------------------------------

def agg_linear_kernel(a_ref, xw_ref, b_ref, w2_ref, o_ref, acc_ref):
    """K-tiled: acc += A_tile @ XW_tile; at last K: o = relu(acc + b1) @ W2."""
    k = pl.program_id(1)

    @pl.when(k == 0)
    def _():
        acc_ref[...] = jnp.zeros_like(acc_ref)

    acc_ref[...] += jnp.dot(a_ref[...], xw_ref[...],
                            preferred_element_type=jnp.float32)

    @pl.when(k == pl.num_programs(1) - 1)
    def _():
        h = jnp.maximum(acc_ref[...] + b_ref[...], 0.0)        # bias + ReLU (f32)
        hw = jnp.dot(h.astype(jnp.bfloat16), w2_ref[...],
                     preferred_element_type=jnp.float32)
        o_ref[...] = hw.astype(o_ref.dtype)


def agg_logsoftmax_kernel(a_ref, hw_ref, b_ref, o_ref, acc_ref, *, num_classes):
    """K-tiled: acc += A_tile @ HW_tile; at last K: masked log_softmax(relu(acc+b2))."""
    k = pl.program_id(1)

    @pl.when(k == 0)
    def _():
        acc_ref[...] = jnp.zeros_like(acc_ref)

    acc_ref[...] += jnp.dot(a_ref[...], hw_ref[...],
                            preferred_element_type=jnp.float32)

    @pl.when(k == pl.num_programs(1) - 1)
    def _():
        z = jnp.maximum(acc_ref[...] + b_ref[...], 0.0)
        col = jax.lax.broadcasted_iota(jnp.int32, z.shape, 1)
        valid = col < num_classes                               # mask padded class lanes
        z = jnp.where(valid, z, -jnp.inf)
        z_max = jnp.max(z, axis=1, keepdims=True)
        zs = z - z_max
        lse = jnp.log(jnp.sum(jnp.where(valid, jnp.exp(zs), 0.0),
                              axis=1, keepdims=True))
        out = zs - lse
        o_ref[...] = jnp.where(valid, out, 0.0)                 # lane-dense f32 store


# ----------------------------- wrapper ---------------------------------------

def gcn_forward(a_hat, x, w1, b1, w2, b2, *, tile_m=256, tile_k=256):
    """Forward pass of GCNModel. Returns [N, C] f32 log-probabilities.

    tile_m: row-tile height over A_hat (output rows per grid step).
    tile_k: reduction-tile width over A_hat's columns.
    Both 256 by default; 512 also fits comfortably in VMEM on all generations.
    """
    N, F = x.shape
    H = w1.shape[1]
    C = w2.shape[1]
    Hp = _round_up(H, LANE)                       # hidden dim padded to lane width
    Cp = _round_up(C, LANE)                       # class dim padded to lane width
    Np = _round_up(N, math.lcm(tile_m, tile_k))   # node dim padded to tile sizes
    grid = (Np // tile_m, Np // tile_k)

    # --- tiny layer-1 feature transform in plain JAX (f32, <1% of FLOPs) ---
    xw1 = jnp.dot(x.astype(jnp.float32), w1.astype(jnp.float32))

    # Cast + zero-pad MXU stream operands to bf16 (single fused XLA pass each);
    # accumulation stays f32 inside the kernels.
    a_p = jnp.pad(a_hat.astype(jnp.bfloat16), ((0, Np - N), (0, Np - N)))
    xw1_p = jnp.pad(xw1.astype(jnp.bfloat16), ((0, Np - N), (0, Hp - H)))
    w2_p = jnp.pad(w2.astype(jnp.bfloat16), ((0, Hp - H), (0, Cp - C)))
    b1_p = jnp.pad(b1.astype(jnp.float32), (0, Hp - H)).reshape(1, Hp)
    b2_p = jnp.pad(b2.astype(jnp.float32), (0, Cp - C)).reshape(1, Cp)

    a_spec = pl.BlockSpec((tile_m, tile_k), lambda i, k: (i, k))

    def k_tile(cols):                              # streamed reduction tile
        return pl.BlockSpec((tile_k, cols), lambda i, k: (k, 0))

    def resident(rows, cols):                      # small constant operands
        return pl.BlockSpec((rows, cols), lambda i, k: (0, 0))

    def out_tile(cols):                            # output resident across K axis
        return pl.BlockSpec((tile_m, cols), lambda i, k: (i, 0))

    # ---- layer-1 aggregation + ReLU, fused with layer-2 transform ----
    hw2 = pl.pallas_call(
        agg_linear_kernel,
        out_shape=jax.ShapeDtypeStruct((Np, Cp), jnp.bfloat16),
        grid=grid,
        in_specs=[a_spec, k_tile(Hp), resident(1, Hp), resident(Hp, Cp)],
        out_specs=out_tile(Cp),
        scratch_shapes=[pltpu.VMEM((tile_m, Hp), jnp.float32)],
        compiler_params=_COMPILER_PARAMS,
    )(a_p, xw1_p, b1_p, w2_p)

    # ---- layer-2 aggregation + ReLU + masked log_softmax ----
    out_p = pl.pallas_call(
        functools.partial(agg_logsoftmax_kernel, num_classes=C),
        out_shape=jax.ShapeDtypeStruct((Np, Cp), jnp.float32),
        grid=grid,
        in_specs=[a_spec, k_tile(Cp), resident(1, Cp)],
        out_specs=out_tile(Cp),
        scratch_shapes=[pltpu.VMEM((tile_m, Cp), jnp.float32)],
        compiler_params=_COMPILER_PARAMS,
    )(a_p, hw2, b2_p)

    return out_p[:N, :C]


# ----------------------------- glue (plain JAX) -------------------------------

def build_normalized_adjacency(edge_index, num_nodes):
    """Dense D^{-1/2}(A + I)D^{-1/2} from a [2, E] edge_index (GCNConv gcn_norm).

    A[dst, src] accumulates duplicate edges (scatter-add), matching PyG.
    """
    src, dst = edge_index[0], edge_index[1]
    a = jnp.zeros((num_nodes, num_nodes), jnp.float32)
    a = a.at[dst, src].add(1.0)
    a = a + jnp.eye(num_nodes, dtype=jnp.float32)       # self-loops
    deg = jnp.sum(a, axis=1)
    d_inv_sqrt = jnp.where(deg > 0, 1.0 / jnp.sqrt(deg), 0.0)
    return a * d_inv_sqrt[:, None] * d_inv_sqrt[None, :]


def gcn_reference(a_hat, x, w1, b1, w2, b2):
    """Pure-JAX f32 reference for correctness."""
    h = jnp.maximum(a_hat @ (x @ w1) + b1[None, :], 0.0)
    z = jnp.maximum(a_hat @ (h @ w2) + b2[None, :], 0.0)
    return jax.nn.log_softmax(z, axis=1)


if __name__ == "__main__":
    # Small synthetic "Cora-like" graph. N chosen so that with 256-tiles we get
    # a (3, 3) grid: exercises the K-axis accumulator init/finalize, row
    # parallelism, and row/lane padding.
    N = 600          # nodes (Np = 768 -> 3 row tiles x 3 K tiles)
    F_IN = 32        # num_features
    HID = 16         # hidden dim of conv1 (as in the module)
    C = 8            # num_classes
    E = 2048         # number of random directed edges

    key = jax.random.PRNGKey(0)
    k_x, k_e, k_w1, k_b1, k_w2, k_b2 = jax.random.split(key, 6)

    x = jax.random.normal(k_x, (N, F_IN), jnp.float32)
    edge_index = jax.random.randint(k_e, (2, E), 0, N, jnp.int32)
    a_hat = build_normalized_adjacency(edge_index, N)

    # Deterministic parameter init (Glorot-like scale), shapes from GCNConv.
    w1 = jax.random.normal(k_w1, (F_IN, HID), jnp.float32) * (1.0 / jnp.sqrt(F_IN))
    b1 = jax.random.normal(k_b1, (HID,), jnp.float32) * 0.01
    w2 = jax.random.normal(k_w2, (HID, C), jnp.float32) * (1.0 / jnp.sqrt(HID))
    b2 = jax.random.normal(k_b2, (C,), jnp.float32) * 0.01

    out = jax.block_until_ready(gcn_forward(a_hat, x, w1, b1, w2, b2))

    # Sanity 1: shape and log_softmax normalization (rows sum to ~1 in prob space).
    assert out.shape == (N, C)
    row_prob_sum = jnp.sum(jnp.exp(out), axis=1)
    assert bool(jnp.all(jnp.abs(row_prob_sum - 1.0) < 1e-4))

    # Sanity 2: close to the pure-f32 reference (loose tol: MXU streams are bf16).
    ref = gcn_reference(a_hat, x, w1, b1, w2, b2)
    max_err = float(jnp.max(jnp.abs(out - ref)))
    assert max_err < 0.15, f"max abs error vs f32 reference: {max_err}"

    print("KERNEL_OK")
</pallas_src>

<mosaic_0001>
module attributes {stable_mosaic.version = 11 : i64} {
  func.func @agg_linear_kernel(%arg0: i32, %arg1: i32, %arg2: memref<256x256xbf16, #tpu.memory_space<vmem>>, %arg3: memref<256x128xbf16, #tpu.memory_space<vmem>>, %arg4: memref<1x128xf32, #tpu.memory_space<vmem>>, %arg5: memref<128x128xbf16, #tpu.memory_space<vmem>>, %arg6: memref<256x128xbf16, #tpu.memory_space<vmem>>, %arg7: memref<256x128xf32, #tpu.memory_space<vmem>>) attributes {dimension_semantics = [#tpu.dimension_semantics<parallel>, #tpu.dimension_semantics<arbitrary>], iteration_bounds = array<i64: 3, 3>, scalar_prefetch = 0 : i64, scratch_operands = 1 : i64, tpu.core_type = #tpu.core_type<tc>, window_params = [{transform_indices = @transform_0, window_bounds = array<i64: 256, 256>}, {transform_indices = @transform_1, window_bounds = array<i64: 256, 128>}, {pipeline_mode = #tpu.pipeline_mode<synchronous>, transform_indices = @transform_2, window_bounds = array<i64: 1, 128>}, {pipeline_mode = #tpu.pipeline_mode<synchronous>, transform_indices = @transform_3, window_bounds = array<i64: 128, 128>}, {transform_indices = @transform_4, window_bounds = array<i64: 256, 128>}]} {
    %c0_i32 = arith.constant 0 : i32
    %0 = arith.cmpi eq, %arg1, %c0_i32 : i32
    %1 = arith.extui %0 : i1 to i32
    %c0_i32_0 = arith.constant 0 : i32
    %2 = arith.cmpi ne, %1, %c0_i32_0 : i32
    scf.if %2 {
      %cst_9 = arith.constant 0.000000e+00 : f32
      %12 = vector.broadcast %cst_9 : f32 to vector<256x128xf32>
      %c0_10 = arith.constant 0 : index
      %c0_11 = arith.constant 0 : index
      %13 = vector.load %arg7[%c0_10, %c0_11] : memref<256x128xf32, #tpu.memory_space<vmem>>, vector<256x128xf32>
      tpu.vector_store %arg7[%c0_10, %c0_11], %12 {strides = array<i32>} : memref<256x128xf32, #tpu.memory_space<vmem>>, vector<256x128xf32>,
    } else {
    }
    %c0 = arith.constant 0 : index
    %c0_1 = arith.constant 0 : index
    %3 = vector.load %arg7[%c0, %c0_1] : memref<256x128xf32, #tpu.memory_space<vmem>>, vector<256x128xf32>
    %c0_2 = arith.constant 0 : index
    %c0_3 = arith.constant 0 : index
    %4 = vector.load %arg2[%c0_2, %c0_3] : memref<256x256xbf16, #tpu.memory_space<vmem>>, vector<256x256xbf16>
    %c0_4 = arith.constant 0 : index
    %c0_5 = arith.constant 0 : index
    %5 = vector.load %arg3[%c0_4, %c0_5] : memref<256x128xbf16, #tpu.memory_space<vmem>>, vector<256x128xbf16>
    %cst = arith.constant dense<0.000000e+00> : vector<256x128xf32>
    %6 = tpu.matmul %4, %5, %cst {dimension_numbers = #tpu.dot_dimension_numbers<[1], [0], [0], [1], [0, 0, 1, 1], [], []>} : vector<256x256xbf16>, vector<256x128xbf16>, vector<256x128xf32> -> vector<256x128xf32>
    %7 = arith.addf %3, %6 : vector<256x128xf32>
    %c0_6 = arith.constant 0 : index
    %c0_7 = arith.constant 0 : index
    %8 = vector.load %arg7[%c0_6, %c0_7] : memref<256x128xf32, #tpu.memory_space<vmem>>, vector<256x128xf32>
    tpu.vector_store %arg7[%c0_6, %c0_7], %7 {strides = array<i32>} : memref<256x128xf32, #tpu.memory_space<vmem>>, vector<256x128xf32>,
    %c2_i32 = arith.constant 2 : i32
    %9 = arith.cmpi eq, %arg1, %c2_i32 : i32
    %10 = arith.extui %9 : i1 to i32
    %c0_i32_8 = arith.constant 0 : i32
    %11 = arith.cmpi ne, %10, %c0_i32_8 : i32
    scf.if %11 {
      %c0_9 = arith.constant 0 : index
      %c0_10 = arith.constant 0 : index
      %12 = vector.load %arg7[%c0_9, %c0_10] : memref<256x128xf32, #tpu.memory_space<vmem>>, vector<256x128xf32>
      %c0_11 = arith.constant 0 : index
      %c0_12 = arith.constant 0 : index
      %13 = vector.load %arg4[%c0_11, %c0_12] : memref<1x128xf32, #tpu.memory_space<vmem>>, vector<1x128xf32>
      %14 = vector.broadcast %13 : vector<1x128xf32> to vector<256x128xf32>
      %15 = arith.addf %12, %14 : vector<256x128xf32>
      %cst_13 = arith.constant 0.000000e+00 : f32
      %16 = vector.broadcast %cst_13 : f32 to vector<256x128xf32>
      %17 = arith.maximumf %15, %16 : vector<256x128xf32>
      %18 = arith.truncf %17 : vector<256x128xf32> to vector<256x128xbf16>
      %c0_14 = arith.constant 0 : index
      %c0_15 = arith.constant 0 : index
      %19 = vector.load %arg5[%c0_14, %c0_15] : memref<128x128xbf16, #tpu.memory_space<vmem>>, vector<128x128xbf16>
      %cst_16 = arith.constant dense<0.000000e+00> : vector<256x128xf32>
      %20 = tpu.matmul %18, %19, %cst_16 {dimension_numbers = #tpu.dot_dimension_numbers<[1], [0], [0], [1], [0, 0, 1, 1], [], []>} : vector<256x128xbf16>, vector<128x128xbf16>, vector<256x128xf32> -> vector<256x128xf32>
      %21 = arith.truncf %20 : vector<256x128xf32> to vector<256x128xbf16>
      %c0_17 = arith.constant 0 : index
      %c0_18 = arith.constant 0 : index
      %22 = vector.load %arg6[%c0_17, %c0_18] : memref<256x128xbf16, #tpu.memory_space<vmem>>, vector<256x128xbf16>
      tpu.vector_store %arg6[%c0_17, %c0_18], %21 {strides = array<i32>} : memref<256x128xbf16, #tpu.memory_space<vmem>>, vector<256x128xbf16>,
    } else {
    }
    return
  }
  func.func @transform_0(%arg0: i32, %arg1: i32) -> (i32, i32) {
    %c0_i32 = arith.constant 0 : i32
    return %arg0, %arg1 : i32, i32
  }
  func.func @transform_1(%arg0: i32, %arg1: i32) -> (i32, i32) {
    %c0_i32 = arith.constant 0 : i32
    %c0_i32_0 = arith.constant 0 : i32
    return %arg1, %c0_i32 : i32, i32
  }
  func.func @transform_2(%arg0: i32, %arg1: i32) -> (i32, i32) {
    %c0_i32 = arith.constant 0 : i32
    %c0_i32_0 = arith.constant 0 : i32
    %c0_i32_1 = arith.constant 0 : i32
    return %c0_i32, %c0_i32_0 : i32, i32
  }
  func.func @transform_3(%arg0: i32, %arg1: i32) -> (i32, i32) {
    %c0_i32 = arith.constant 0 : i32
    %c0_i32_0 = arith.constant 0 : i32
    %c0_i32_1 = arith.constant 0 : i32
    return %c0_i32, %c0_i32_0 : i32, i32
  }
  func.func @transform_4(%arg0: i32, %arg1: i32) -> (i32, i32) {
    %c0_i32 = arith.constant 0 : i32
    %c0_i32_0 = arith.constant 0 : i32
    return %arg0, %c0_i32 : i32, i32
  }
}

</mosaic_0001>

<bundles_post_ra>
// kernel: tpu_custom_call.1
= control target key start
LH: loop header
LB: loop body
LE: loop exit
PB: predicated region body
PF: predicated region fallthrough
CT: control target
= control target key end

     0   :  { %s2998_s0 = inlined_call_operand.hbm [shape: bf16[768,768], index: 0, kind: input, shape index: {}]   ;;  %s2999_s1 = inlined_call_operand.hbm [shape: bf16[768,128], index: 1, kind: input, shape index: {}]   ;;  %s3000_s2 = inlined_call_operand.hbm [shape: f32[1,128], index: 2, kind: input, shape index: {}]   ;;  %s3001_s3 = inlined_call_operand.hbm [shape: bf16[128,128], index: 3, kind: input, shape index: {}]   ;;  %s3002_s4 = inlined_call_operand.hbm [shape: bf16[768,128], index: 4, kind: output, shape index: {}]  }
   0x1   :  { %3020 = sst [smem:[#allocation27_spill]] %s2998_s0 }
   0x2   :  { %3021 = sst [smem:[#allocation28_spill]] %s3000_s2 }
   0x3   :  { %3022 = sst [smem:[#allocation29_spill]] %s3001_s3 }
   0x4   :  { %3023 = sst [smem:[#allocation30_spill]] %s3002_s4 }
   0x5   :  { %9 = vsyncpa [#allocation4], 0 }
   0x6   :  { %11 = vsyncpa [#allocation4 + $0x1], 0 }
   0x7   :  { %12 = vsyncpa [#allocation7], 0 }
   0x8   :  { %14 = vsyncpa [#allocation7 + $0x1], 0 }
   0x9   :  { %15 = vsyncpa [#allocation10], 0 }
   0xa   :  { %16 = vsyncpa [#allocation5], 0 }
   0xb   :  { %18 = vsyncpa [#allocation5 + $0x1], 0  ;;  %s2567_s15 = smov 0   ;;  %s2569_s16 = smov 0  }
   0xc   :  { %s2571_s17 = smov 0   ;;  %s2573_s18 = smov 0  }
   0xd   :  { %s2575_s19 = smov 0   ;;  %s2577_s20 = smov 0  }
   0xe   :  { %s2579_s21 = smov 0   ;;  %s2581_s22 = smov 0  }
   0xf   :  { %s2583_s23 = smov 0   ;;  %s2585_s24 = smov 0  }
  0x10   :  { %s2587_s25 = smov 0   ;;  %s2589_s26 = smov 0  }
  0x11   :  { %s2591_s27 = smov 0   ;;  %s2593_s28 = smov 0  }
  0x12 LB: > { %3024 = sst [smem:[#allocation17_spill]] %s2475_s15  ;;  %s2634_s29 = sadd.s32 4294967295, %s2527_s28   ;;  %s2527_s28 = sphi %s2593_s28, %s24_s28   ;;  %s2523_s27 = sphi %s2591_s27, %s3086_s27   ;;  %s2519_s26 = sphi %s2589_s26, %s3085_s26   ;;  %s2515_s25 = sphi %s2587_s25, %s3071_s25   ;;  %s2511_s24 = sphi %s2585_s24, %s3084_s24   ;;  %s2507_s23 = sphi %s2583_s23, %s3083_s23   ;;  %s2503_s22 = sphi %s2581_s22, %s3082_s22   ;;  %s2499_s21 = sphi %s2579_s21, %s3081_s21   ;;  %s2495_s20 = sphi %s2577_s20, %s3080_s20   ;;  %s2491_s19 = sphi %s2575_s19, %s3079_s19   ;;  %s2487_s18 = sphi %s2573_s18, %s3078_s18   ;;  %s2483_s17 = sphi %s2571_s17, %s3077_s17   ;;  %s2479_s16 = sphi %s2569_s16, %s3076_s16   ;;  %s2475_s15 = sphi %s2567_s15, %s3075_s15  }
  0x13   : > { %3025 = sst [smem:[#allocation18_spill]] %s2479_s16  ;;  %s1570_s30 = sadd.s32 4294967294, %s2527_s28  }
  0x14   : > { %3026 = sst [smem:[#allocation19_spill]] %s2511_s24  ;;  %p58_p0 = scmp.ne.s32.totalorder %s2503_s22, %s2499_s21 }
  0x15   : > { %3027 = sst [smem:[#allocation20_spill]] %s2515_s25  ;;  %p3004_p1 = scmp.eq.s32.totalorder %s2634_s29, 0 }
  0x16   : > { %3028 = sst [smem:[#allocation21_spill]] %s2523_s27  ;;  %p84_p2 = scmp.ne.s32.totalorder %s2491_s19, %s2487_s18 }
  0x17   : > { %p2643_p3 = por %p3004_p1, %p58_p0  ;;  %p149_p4 = scmp.ne.s32.totalorder %s2483_s17, %s2479_s16 }
  0x18   : > { %p2651_p5 = por %p84_p2, %p3004_p1  ;;  %p150_p6 = scmp.eq.s32.totalorder %s2634_s29, 8 }
  0x19   : > { %s3029_s6 = scalar_select %p2643_p3, 1, 0 }
  0x1a   : > { %s3030_s7 = scalar_select %p2651_p5, 1, 0 }
  0x1b   : > { %p155_p7 = scmp.ne.s32.totalorder %s2479_s16, %s2475_s15  ;;  %p156_p8 = scmp.eq.s32.totalorder %s1570_s30, 8 }
  0x1c   : > { %p2658_p9 = por %p150_p6, %p149_p4  ;;  %p1571_p10 = scmp.ge.s32.totalorder %s2527_s28, 1 }
  0x1d   : > { %p2663_p11 = por %p156_p8, %p155_p7  ;;  %p163_p12 = scmp.lt.s32.totalorder %s2527_s28, 10 }
  0x1e   : > { %s3031_s8 = scalar_select %p2658_p9, 1, 0 }
  0x1f   : > { %s3033_s9 = scalar_select %p2663_p11, 1, 0 }
  0x20   : > { %3032 = sst [smem:[#allocation22_spill]] %s3031_s8  ;;  %p2668_p13 = pnand %p1571_p10, %p163_p12 }
  0x21   : > { %3034 = sst [smem:[#allocation23_spill]] %s3033_s9  ;;  %s2529_s11 = smov [#allocation8]  }
  0x22   : > { %s3035_s10 = scalar_select %p2668_p13, 1, 0 }
  0x23   : > { %s176_s12 = sshll.u32 %s2529_s11, 4  ;;  %p2045_p0 = pneg %p2668_p13  ;;  %s177_s12 = int_to_ptr.vmem [resolvable:$true] %s176_s12 }
  0x24   : > { %s2530_s13 = smov [#allocation9]   ;;  %s2274_s21 = scalar_lea.vmem %s177_s12, 16 }
  0x25   : > { %s186_s14 = sshll.u32 %s2530_s13, 4  ;;  %p2676_p2 = pnand %p2045_p0, %p3004_p1  ;;  %s187_s14 = int_to_ptr.vmem [resolvable:$true] %s186_s14 }
  0x26   : > { %p2275_p6 = scmp.ne.s32.totalorder %s177_s12, %s2274_s21  ;;  %s2281_s30 = scalar_lea.vmem %s177_s12, 32 }
  0x27   : > { %p2265_p4 = pneg %p2676_p2  ;;  %p2282_p10 = scmp.lt.s32.totalorder %s177_s12, %s177_s12 }
  0x28   : > { %p2283_p12 = scmp.lt.s32.totalorder %s2281_s30, %s2274_s21 }
  0x29   : > { %p2277_p7 = pnand %p2275_p6, %p2265_p4 }
  0x2a   : > { %p2284_p11 = por %p2283_p12, %p2282_p10 }
  0x2b   : > { %p2278_p8 = pneg %p2277_p7 }
  0x2d   : > { %p2285_p9 = pnand %p2284_p11, %p2278_p8 }
  0x2f   : > { %2288 = shalt.err (!%p2285_p9)
}
  0x30   : > { %s3037_s2 = sld [smem:[#allocation28_spill]]  ;;  %s2300_s5 = scalar_lea.vmem %s187_s14, 1024 }
  0x31   : > { %p2301_p0 = scmp.ne.s32.totalorder %s187_s14, %s2300_s5  ;;  %p2308_p7 = scmp.lt.s32.totalorder %s187_s14, %s187_s14 }
  0x32   : > { %p2309_p5 = scmp.lt.s32.totalorder %s2300_s5, %s2300_s5 }
  0x33   : > { %p2303_p1 = pnand %p2301_p0, %p2265_p4 }
  0x34   : > { %p2310_p3 = por %p2309_p5, %p2308_p7 }
  0x35   : > { %p2304_p6 = pneg %p2303_p1 }
  0x36   : > { %2048 = dma.hbm_to_vmem [thread:$0]  (!%p2676_p2), %s3037_s2, 16, %s177_s12, [#allocation7]  }
  0x37   : > { %p2311_p13 = pnand %p2310_p3, %p2304_p6 }
  0x39   : > { %2314 = shalt.err (!%p2311_p13)
}
  0x3a   : > { %s3008_s21 = smov 64   ;;  %s3009_s12 = smov 4  }
  0x3b   : > { %s3038_s3 = sld [smem:[#allocation29_spill]]  ;;  %s33_s11 = sadd.s32 1, %s2519_s26 }
  0x3c   : > { %s36_s13 = sadd.s32 1, %s2523_s27  ;;  %p34_p1 = scmp.ge.s32.totalorder %s33_s11, 3 }
  0x3d   : > { %s45_s2 = sadd.s32 1, %s2507_s23  ;;  %p52_p3 = scmp.ne.s32.totalorder %s2507_s23, %s2503_s22 }
  0x3e   : > { %p53_p5 = scmp.eq.s32.totalorder %s2527_s28, 0  ;;  %s3088_s11 = smov (%p34_p1, %s33_s11), 0 }
  0x3f   : > { %3039 = sst [smem:[#allocation24_spill]] %s3088_s11  ;;  %s3090_s13 = smov (!%p34_p1, %s36_s13), %s2523_s27 }
  0x40   : > { %s2712_s18 = ssub.s32 %s2519_s26, %s3088_s11  ;;  %p2716_p9 = por %p53_p5, %p52_p3 }
  0x41   : > { %2051 = dma.hbm_to_vmem [thread:$0]  (!%p2676_p2), %s3038_s3, 1024, %s187_s14, [#allocation10], %s3008_s21, %s3008_s21, %s3009_s12  }
  0x42   : > { %p38_p11 = scmp.ge.s32.totalorder %s3090_s13, 3  ;;  %p69_p13 = scmp.eq.s32.totalorder %s2712_s18, 0 }
  0x43   : > { %p2065_p2 = scmp.lt.s32.totalorder %s2527_s28, 9  ;;  %s200_s5 = sand.u32 1, %s2507_s23  }
  0x44   : > { %s3092_s13 = smov (%p38_p11, %s3090_s13), 0  ;;  %s1575_s30 = sshll.u32 %s200_s5, 8 }
  0x45   : > { %3041 = sst [smem:[#allocation25_spill]] %s3092_s13  ;;  %s40_s21 = ssub.s32 %s2523_s27, %s3092_s13 }
  0x46   : > { %s42_s12 = sor.u32 %s2712_s18, %s40_s21  ;;  %p137_p4 = scmp.eq.s32.totalorder %s40_s21, 0 }
  0x47   : > { %p43_p8 = scmp.eq.s32.totalorder %s42_s12, 0  ;;  %s1577_s3 = sshll.u32 %s2519_s26, 1 }
  0x48   : > { %s3042_s11 = sadd.s32 1, %s2483_s17  ;;  %s2030_s4 = smul.u32 192, %s2523_s27 }
  0x49   : > { %s2732_s9 = scalar_select %p137_p4, %s2483_s17, %s3042_s11  }
  0x4a   : > { %s2735_s15 = scalar_select %p43_p8, %s2507_s23, %s45_s2  }
  0x4b   : > { %3043 = sst [smem:[#allocation26_spill]] %s2732_s9  ;;  %s204_s8 = scalar_lea.vmem [#allocation3], %s1575_s30 }
  0x4c   : > { %s214_s25 = sshll.u32 %s204_s8, 4  ;;  %p2742_p10 = pnand %p2065_p2, %p2716_p9  ;;  %s215_s25 = int_to_ptr.vmem [resolvable:$true] %s214_s25 }
  0x4d   : > { %s211_s13 = sadd.s32 %s2030_s4, %s1577_s3  ;;  %s3045_s0 = sld [smem:[#allocation27_spill]] }
  0x4e   : > { %s1579_s21 = sshll.u32 %s211_s13, 6  ;;  %s201_s9 = scalar_lea.sflag [#allocation4], %s200_s5 }
  0x4f   : > { %p2317_p12 = pneg %p2742_p10  ;;  %s2328_s2 = scalar_lea.vmem %s215_s25, 4096 }
  0x50   : > { %p2329_p0 = scmp.ne.s32.totalorder %s215_s25, %s2328_s2  ;;  %s2533_s8 = smov [#allocation3]  }
  0x51   : > { %s2333_s14 = sshll.u32 %s2533_s8, 4  ;;  %s2334_s14 = int_to_ptr.vmem [resolvable:$false] %s2333_s14 }
  0x52   : > { %p2331_p6 = pnand %p2329_p0, %p2317_p12  ;;  %s2335_s30 = scalar_lea.vmem %s2334_s14, 8192 }
  0x53   : > { %s213_s11 = scalar_lea.hbm %s3045_s0, %s1579_s21  ;;  %p2336_p1 = scmp.lt.s32.totalorder %s215_s25, %s2334_s14 }
  0x54   : > { %p2332_p7 = pneg %p2331_p6  ;;  %p2337_p3 = scmp.lt.s32.totalorder %s2335_s30, %s2328_s2 }
  0x56   : > { %p2338_p9 = por %p2337_p3, %p2336_p1 }
  0x58   : > { %p2339_p11 = pnand %p2338_p9, %p2332_p7 }
  0x5a   : > { %2342 = shalt.err (!%p2339_p11)
}
  0x5b   : > { %s2534_s3 = smov 384   ;;  %s2535_s4 = smov 128  }
  0x5c   : > { %s2536_s16 = smov 8   ;;  %s224_s13 = sand.u32 1, %s2527_s28  }
  0x5d   : > { %2055 = dma.hbm_to_vmem [thread:$0]  (!%p2742_p10), %s213_s11, 4096, %s215_s25, %s201_s9, %s2534_s3, %s2535_s4, %s2536_s16  }
  0x5e   : > { %s71_s5 = sadd.s32 1, %s2495_s20  ;;  %p78_p4 = scmp.ne.s32.totalorder %s2495_s20, %s2491_s19 }
  0x5f   : > { %s2760_s21 = scalar_select %p69_p13, %s2495_s20, %s71_s5  }
  0x60   : > { %p80_p8 = por %p78_p4, %p53_p5  ;;  %s226_s12 = sand.u32 1, %s2495_s20  }
  0x61   : > { %s1685_s2 = sshll.u32 %s2519_s26, 11  ;;  %s1580_s8 = sshll.u32 %s226_s12, 7 }
  0x62   : > { %s234_s0 = scalar_lea.hbm %s2999_s1, %s1685_s2  ;;  %p2771_p12 = pnand %p2065_p2, %p80_p8 }
  0x63   : > { %s228_s24 = scalar_lea.vmem [#allocation6], %s1580_s8  ;;  %s225_s9 = scalar_lea.sflag [#allocation7], %s224_s13 }
  0x64   : > { %s235_s25 = sshll.u32 %s228_s24, 4  ;;  %p2345_p13 = pneg %p2771_p12  ;;  %s236_s25 = int_to_ptr.vmem [resolvable:$true] %s235_s25 }
  0x65   : > { %s2356_s18 = scalar_lea.vmem %s236_s25, 2048  ;;  %s2537_s11 = smov [#allocation6]  }
  0x66   : > { %p2357_p5 = scmp.ne.s32.totalorder %s236_s25, %s2356_s18  ;;  %s2361_s3 = sshll.u32 %s2537_s11, 4  ;;  %s2362_s3 = int_to_ptr.vmem [resolvable:$false] %s2361_s3 }
  0x67   : > { %s2363_s4 = scalar_lea.vmem %s2362_s3, 4096  ;;  %p2364_p6 = scmp.lt.s32.totalorder %s236_s25, %s2362_s3 }
  0x68   : > { %p2359_p10 = pnand %p2357_p5, %p2345_p13  ;;  %p2365_p2 = scmp.lt.s32.totalorder %s2363_s4, %s2356_s18 }
  0x6a   : > { %p2360_p0 = pneg %p2359_p10  ;;  %p2366_p7 = por %p2365_p2, %p2364_p6 }
  0x6c   : > { %p2367_p1 = pnand %p2366_p7, %p2360_p0 }
  0x6e   : > { %2370 = shalt.err (!%p2367_p1)
}
  0x6f   : > { %s3047_s16 = smov 4   ;;  %s3048_s5 = smov 64  }
  0x70   : > { %2058 = dma.hbm_to_vmem [thread:$0]  (!%p2771_p12), %s234_s0, 2048, %s236_s25, %s225_s9, %s3048_s5, %s3048_s5, %s3047_s16  }
  0x71   : > { %p3049_p3 = scmp.ne.s32.totalorder %s3035_s10, 0 }
  0x72   : > { %s249_s13 = sand.u32 (!%p3049_p3), 1, %s2503_s22   ;;  %p3050_p9 = scmp.ne.s32.totalorder (!%p3049_p3), %s3029_s6, 0 }
  0x73   : > { %247 = sbr.rel (%p3049_p3) target bundleno = 743 (0x2e7), region = 36  ;;  %s1584_s12 = sshll.u32 (!%p3049_p3), %s249_s13, 8 }
  0x74   : > { %s250_s2 = scalar_lea.sflag (!%p3049_p3), [#allocation4], %s249_s13  ;;  %s2785_s8 = scalar_lea.vmem (!%p3049_p3), [#allocation3], %s1584_s12 }
  0x78   : > { %2454 = dma.done.wait (%p3050_p9), %s250_s2, 4096  }
  0x79   : > { %2456 = vsyncadd (%p3050_p9), %s250_s2, 4294963200  ;;  %s258_s27 = sand.u32 1, %s2634_s29   ;;  %s260_s0 = sand.u32 1, %s2491_s19  }
  0x7a   : > { %s1585_s14 = sshll.u32 %s260_s0, 7  ;;  %s259_s10 = scalar_lea.sflag [#allocation7], %s258_s27 }
  0x7b   : > { %s2793_s30 = scalar_lea.vmem [#allocation6], %s1585_s14  ;;  %p3051_p11 = scmp.ne.s32.totalorder %s3030_s7, 0 }
  0x7d   : > { %2458 = dma.done.wait (%p3051_p11), %s259_s10, 2048  }
  0x7e   : > { %2460 = vsyncadd (%p3051_p11), %s259_s10, 4294965248  ;;  %p3052_p4 = scmp.eq.s32.totalorder %s2634_s29, 0 }
  0x80   : > { %2462 = dma.done.wait (%p3052_p4), [#allocation7], 16   ;;  %p3053_p8 = pmov %p3052_p4 }
  0x81   : > { %p3054_p12 = pmov %p3052_p4 }
  0x82   : > { %2464 = vsyncadd (%p3053_p8), [#allocation7], 4294967280 }
  0x83   : > { %2466 = dma.done.wait (%p3054_p12), [#allocation10], 1024   ;;  %p3055_p13 = pmov %p3052_p4 }
  0x84   : > { %s3056_s6 = sld [smem:[#allocation18_spill]] }
  0x85   : > { %2468 = vsyncadd (%p3055_p13), [#allocation10], 4294966272  ;;  %s3057_s7 = sld [smem:[#allocation19_spill]] }
  0x8a   : > { %s297_s24 = sand.u32 1, %s3056_s6  }
  0x8b   : > { %s1588_s25 = sshll.u32 %s297_s24, 7  ;;  %p1589_p5 = scmp.ne.s32.totalorder %s3057_s7, 0 }
  0x8c   : > { %s2810_s9 = scalar_lea.vmem [#allocation11], %s1588_s25 }
  0x8d   : > { %308 = sbr.rel (%p1589_p5) target bundleno = 163 (0xa3), region = 56 }
  0x92   : > { %v2538_v0 = vmov 0.0  }
  0x93   : > { %309 = vst [vmem:[#allocation2 + $0xb0] sm:$0xff] %v2538_v0  ;;  %310 = vst [vmem:[#allocation2] sm:$0xff] %v2538_v0 }
  0x94   : > { %311 = vst [vmem:[#allocation2 + $0xd8] sm:$0xff] %v2538_v0  ;;  %312 = vst [vmem:[#allocation2 + $0x18] sm:$0xff] %v2538_v0 }
  0x95   : > { %313 = vst [vmem:[#allocation2 + $0x50] sm:$0xff] %v2538_v0  ;;  %314 = vst [vmem:[#allocation2 + $0x68] sm:$0xff] %v2538_v0 }
  0x96   : > { %315 = vst [vmem:[#allocation2 + $0x30] sm:$0xff] %v2538_v0  ;;  %316 = vst [vmem:[#allocation2 + $0x48] sm:$0xff] %v2538_v0 }
  0x97   : > { %317 = vst [vmem:[#allocation2 + $0x80] sm:$0xff] %v2538_v0  ;;  %318 = vst [vmem:[#allocation2 + $0x88] sm:$0xff] %v2538_v0 }
  0x98   : > { %319 = vst [vmem:[#allocation2 + $0xe8] sm:$0xff] %v2538_v0  ;;  %320 = vst [vmem:[#allocation2 + $0xb8] sm:$0xff] %v2538_v0 }
  0x99   : > { %321 = vst [vmem:[#allocation2 + $0x60] sm:$0xff] %v2538_v0  ;;  %322 = vst [vmem:[#allocation2 + $0xf0] sm:$0xff] %v2538_v0 }
  0x9a   : > { %323 = vst [vmem:[#allocation2 + $0x8] sm:$0xff] %v2538_v0  ;;  %324 = vst [vmem:[#allocation2 + $0x78] sm:$0xff] %v2538_v0 }
  0x9b   : > { %325 = vst [vmem:[#allocation2 + $0x38] sm:$0xff] %v2538_v0  ;;  %326 = vst [vmem:[#allocation2 + $0x58] sm:$0xff] %v2538_v0 }
  0x9c   : > { %327 = vst [vmem:[#allocation2 + $0x40] sm:$0xff] %v2538_v0  ;;  %328 = vst [vmem:[#allocation2 + $0xc8] sm:$0xff] %v2538_v0 }
  0x9d   : > { %329 = vst [vmem:[#allocation2 + $0xe0] sm:$0xff] %v2538_v0  ;;  %330 = vst [vmem:[#allocation2 + $0x90] sm:$0xff] %v2538_v0 }
  0x9e   : > { %331 = vst [vmem:[#allocation2 + $0x70] sm:$0xff] %v2538_v0  ;;  %332 = vst [vmem:[#allocation2 + $0xc0] sm:$0xff] %v2538_v0 }
  0x9f   : > { %333 = vst [vmem:[#allocation2 + $0xa8] sm:$0xff] %v2538_v0  ;;  %334 = vst [vmem:[#allocation2 + $0xd0] sm:$0xff] %v2538_v0 }
  0xa0   : > { %335 = vst [vmem:[#allocation2 + $0x10] sm:$0xff] %v2538_v0  ;;  %336 = vst [vmem:[#allocation2 + $0x28] sm:$0xff] %v2538_v0 }
  0xa1   : > { %337 = vst [vmem:[#allocation2 + $0xa0] sm:$0xff] %v2538_v0  ;;  %338 = vst [vmem:[#allocation2 + $0xf8] sm:$0xff] %v2538_v0 }
  0xa2   : > { %339 = vst [vmem:[#allocation2 + $0x20] sm:$0xff] %v2538_v0  ;;  %340 = vst [vmem:[#allocation2 + $0x98] sm:$0xff] %v2538_v0 }
  0xa3 PF: > { %v2191_v1 = vld [vmem:[%s2793_s30 + $0x78] sm:$0xff]   ;;  %v2193_v3 = vld [vmem:[%s2793_s30 + $0x70] sm:$0xff]   ;;  %v2195_v5 = vld [vmem:[%s2793_s30 + $0x68] sm:$0xff]   ;;  %s3058_s29 = sld [smem:[#allocation19_spill]] }
  0xa4   : > { %v2192_v2 = vld [vmem:[%s2793_s30 + $0x38] sm:$0xff]   ;;  %1814 = vmatprep.subr.bf16.mxu0 %v2191_v1  ;;  %1998 = vmatprep.subr.bf16.mxu1 %v2191_v1  ;;  %v2194_v4 = vld [vmem:[%s2793_s30 + $0x30] sm:$0xff]   ;;  %v2196_v6 = vld [vmem:[%s2793_s30 + $0x28] sm:$0xff]  }
  0xa5   : > { %1815 = vmatpush3.bf16.msra.mxu0 %v2192_v2  ;;  %2006 = vmatpush3.bf16.msra.mxu1 %v2192_v2  ;;  %v2197_v7 = vld [vmem:[%s2793_s30 + $0x60] sm:$0xff]   ;;  %v2199_v9 = vld [vmem:[%s2793_s30 + $0x58] sm:$0xff]   ;;  %v2201_v11 = vld [vmem:[%s2793_s30 + $0x50] sm:$0xff]  }
  0xa6   : > { %1816 = vmatprep.subr.bf16.mxu0 %v2193_v3  ;;  %1999 = vmatprep.subr.bf16.mxu1 %v2193_v3  ;;  %v2198_v8 = vld [vmem:[%s2793_s30 + $0x20] sm:$0xff]   ;;  %v2200_v10 = vld [vmem:[%s2793_s30 + $0x18] sm:$0xff]   ;;  %v2202_v14 = vld [vmem:[%s2793_s30 + $0x10] sm:$0xff]  }
  0xa7   : > { %v2209_v12 = vld [vmem:[%s2785_s8 + $0x4] ss:$8 sps:$4 sm:$0xff]   ;;  %v2207_v19 = vld [vmem:[%s2785_s8] ss:$8 sps:$4 sm:$0xff]   ;;  %v2213_v21 = vld [vmem:[%s2785_s8 + $0x14] ss:$8 sps:$4 sm:$0xff]  }
  0xa8   : > { %v2212_v13 = vld [vmem:[%s2785_s8 + $0x84] ss:$8 sps:$4 sm:$0xff]   ;;  %725 = vmatprep.mubr.bf16.mxu0 %v2209_v12  ;;  %v2210_v20 = vld [vmem:[%s2785_s8 + $0x80] ss:$8 sps:$4 sm:$0xff]   ;;  %v2215_v22 = vld [vmem:[%s2785_s8 + $0x94] ss:$8 sps:$4 sm:$0xff]  }
  0xa9   : > { %1817 = vmatpush3.bf16.msra.mxu0 %v2194_v4  ;;  %2007 = vmatpush3.bf16.msra.mxu1 %v2194_v4  ;;  %v2203_v15 = vld [vmem:[%s2793_s30 + $0x48] sm:$0xff]   ;;  %v2205_v17 = vld [vmem:[%s2793_s30 + $0x40] sm:$0xff]   ;;  %v2217_v23 = vld [vmem:[%s2785_s8 + $0x10] ss:$8 sps:$4 sm:$0xff]   ;;  %p1638_p10 = scmp.ne.s32.totalorder %s3058_s29, 2 }
  0xaa   : > { %1818 = vmatprep.subr.bf16.mxu0 %v2195_v5  ;;  %2000 = vmatprep.subr.bf16.mxu1 %v2195_v5  ;;  %v2204_v16 = vld [vmem:[%s2793_s30 + $0x8] sm:$0xff]   ;;  %v2206_v18 = vld [vmem:[%s2793_s30] sm:$0xff]   ;;  %v2218_v24 = vld [vmem:[%s2785_s8 + $0x90] ss:$8 sps:$4 sm:$0xff]  }
  0xab   : > { %789 = vmatprep.mubr.bf16.mxu1 %v2212_v13  ;;  %v2219_v25 = vld [vmem:[%s2785_s8 + $0x24] ss:$8 sps:$4 sm:$0xff]   ;;  %v2223_v27 = vld [vmem:[%s2785_s8 + $0x20] ss:$8 sps:$4 sm:$0xff]   ;;  %v2225_v29 = vld [vmem:[%s2785_s8 + $0x34] ss:$8 sps:$4 sm:$0xff]  }
  0xac   : > { %v2221_v26 = vld [vmem:[%s2785_s8 + $0xa4] ss:$8 sps:$4 sm:$0xff]   ;;  %v2224_v28 = vld [vmem:[%s2785_s8 + $0xa0] ss:$8 sps:$4 sm:$0xff]   ;;  %v2227_v30 = vld [vmem:[%s2785_s8 + $0xb4] ss:$8 sps:$4 sm:$0xff]  }
  0xad   : > { %1819 = vmatpush3.bf16.msra.mxu0 %v2196_v6  ;;  %2008 = vmatpush3.bf16.msra.mxu1 %v2196_v6  ;;  %v2229_v31 = vld [vmem:[%s2785_s8 + $0x30] ss:$8 sps:$4 sm:$0xff]   ;;  %v2231_v33 = vld [vmem:[%s2785_s8 + $0x44] ss:$8 sps:$4 sm:$0xff]   ;;  %v2235_v35 = vld [vmem:[%s2785_s8 + $0x40] ss:$8 sps:$4 sm:$0xff]  }
  0xae   : > { %1820 = vmatprep.subr.bf16.mxu0 %v2197_v7  ;;  %2001 = vmatprep.subr.bf16.mxu1 %v2197_v7  ;;  %v2230_v32 = vld [vmem:[%s2785_s8 + $0xb0] ss:$8 sps:$4 sm:$0xff]   ;;  %v2233_v34 = vld [vmem:[%s2785_s8 + $0xc4] ss:$8 sps:$4 sm:$0xff]   ;;  %v2236_v36 = vld [vmem:[%s2785_s8 + $0xc0] ss:$8 sps:$4 sm:$0xff]  }
  0xaf   : > { %v2237_v37 = vld [vmem:[%s2785_s8 + $0x54] ss:$8 sps:$4 sm:$0xff]   ;;  %v2241_v39 = vld [vmem:[%s2785_s8 + $0x50] ss:$8 sps:$4 sm:$0xff]   ;;  %v2243_v41 = vld [vmem:[%s2785_s8 + $0x64] ss:$8 sps:$4 sm:$0xff]  }
  0xb0   : > { %v2239_v38 = vld [vmem:[%s2785_s8 + $0xd4] ss:$8 sps:$4 sm:$0xff]   ;;  %v2242_v40 = vld [vmem:[%s2785_s8 + $0xd0] ss:$8 sps:$4 sm:$0xff]   ;;  %v2245_v42 = vld [vmem:[%s2785_s8 + $0xe4] ss:$8 sps:$4 sm:$0xff]  }
  0xb1   : > { %1821 = vmatpush3.bf16.msra.mxu0 %v2198_v8  ;;  %2009 = vmatpush3.bf16.msra.mxu1 %v2198_v8  ;;  %v2247_v43 = vld [vmem:[%s2785_s8 + $0x60] ss:$8 sps:$4 sm:$0xff]   ;;  %v2249_v45 = vld [vmem:[%s2785_s8 + $0x74] ss:$8 sps:$4 sm:$0xff]   ;;  %v2253_v47 = vld [vmem:[%s2785_s8 + $0x70] ss:$8 sps:$4 sm:$0xff]  }
  0xb2   : > { %1822 = vmatprep.subr.bf16.mxu0 %v2199_v9  ;;  %2002 = vmatprep.subr.bf16.mxu1 %v2199_v9  ;;  %v2248_v44 = vld [vmem:[%s2785_s8 + $0xe0] ss:$8 sps:$4 sm:$0xff]   ;;  %v2251_v46 = vld [vmem:[%s2785_s8 + $0xf4] ss:$8 sps:$4 sm:$0xff]   ;;  %v2254_v48 = vld [vmem:[%s2785_s8 + $0xf0] ss:$8 sps:$4 sm:$0xff]  }
  0xb3   : > { %v341_v51 = vld [vmem:[#allocation2 + $0xb0] sm:$0xff]  ;;  %v357_v53 = vld [vmem:[#allocation2 + $0x38] sm:$0xff]  ;;  %v342_v61 = vld [vmem:[#allocation2] sm:$0xff] }
  0xb4   : > { %v358_v63 = vld [vmem:[#allocation2 + $0x58] sm:$0xff]  ;;  %v359_v9 = vld [vmem:[#allocation2 + $0x40] sm:$0xff] }
  0xb5   : > { %1823 = vmatpush3.bf16.msra.mxu0 %v2200_v10  ;;  %2010 = vmatpush3.bf16.msra.mxu1 %v2200_v10  ;;  %v343_v7 = vld [vmem:[#allocation2 + $0xd8] sm:$0xff] }
  0xb6   : > { %1824 = vmatprep.subr.bf16.mxu0 %v2201_v11  ;;  %2003 = vmatprep.subr.bf16.mxu1 %v2201_v11 }
  0xb9   : > { %1825 = vmatpush3.bf16.msra.mxu0 %v2202_v14  ;;  %2011 = vmatpush3.bf16.msra.mxu1 %v2202_v14 }
  0xba   : > { %1826 = vmatprep.subr.bf16.mxu0 %v2203_v15  ;;  %2004 = vmatprep.subr.bf16.mxu1 %v2203_v15 }
  0xbd   : > { %1827 = vmatpush3.bf16.msra.mxu0 %v2204_v16  ;;  %2012 = vmatpush3.bf16.msra.mxu1 %v2204_v16 }
  0xbe   : > { %1828 = vmatprep.subr.bf16.mxu0 %v2205_v17  ;;  %2005 = vmatprep.subr.bf16.mxu1 %v2205_v17  ;;  %v344_v17 = vld [vmem:[#allocation2 + $0x18] sm:$0xff] }
  0xc1   : > { %1829 = vmatpush3.bf16.msra.mxu0 %v2206_v18  ;;  %2013 = vmatpush3.bf16.msra.mxu1 %v2206_v18 }
  0xc4   : > { %726 = vmatmul.mubr.bf16.vlgmr.msra.gmra.mxu0 %v2207_v19  ;;  %790 = vmatmul.mubr.bf16.vlgmr.msra.gmra.mxu1 %v2210_v20  ;;  %v360_v19 = vld [vmem:[#allocation2 + $0xc8] sm:$0xff] }
  0xc5   : > { %733 = vmatprep.mubr.bf16.mxu0 %v2213_v21  ;;  %797 = vmatprep.mubr.bf16.mxu1 %v2215_v22 }
  0xcc   : > { %734 = vmatmul.mubr.bf16.gmra.mxu0 %v2217_v23  ;;  %798 = vmatmul.mubr.bf16.gmra.mxu1 %v2218_v24 }
  0xcd   : > { %741 = vmatprep.mubr.bf16.mxu0 %v2219_v25  ;;  %805 = vmatprep.mubr.bf16.mxu1 %v2221_v26 }
  0xd4   : > { %742 = vmatmul.mubr.bf16.gmra.mxu0 %v2223_v27  ;;  %806 = vmatmul.mubr.bf16.gmra.mxu1 %v2224_v28  ;;  %v345_v27 = vld [vmem:[#allocation2 + $0x50] sm:$0xff] }
  0xd5   : > { %749 = vmatprep.mubr.bf16.mxu0 %v2225_v29  ;;  %813 = vmatprep.mubr.bf16.mxu1 %v2227_v30  ;;  %v361_v29 = vld [vmem:[#allocation2 + $0xe0] sm:$0xff] }
  0xdc   : > { %750 = vmatmul.mubr.bf16.gmra.mxu0 %v2229_v31  ;;  %814 = vmatmul.mubr.bf16.gmra.mxu1 %v2230_v32 }
  0xdd   : > { %757 = vmatprep.mubr.bf16.mxu0 %v2231_v33  ;;  %821 = vmatprep.mubr.bf16.mxu1 %v2233_v34 }
  0xe4   : > { %758 = vmatmul.mubr.bf16.gmra.mxu0 %v2235_v35  ;;  %822 = vmatmul.mubr.bf16.gmra.mxu1 %v2236_v36 }
  0xe5   : > { %765 = vmatprep.mubr.bf16.mxu0 %v2237_v37  ;;  %829 = vmatprep.mubr.bf16.mxu1 %v2239_v38  ;;  %v346_v37 = vld [vmem:[#allocation2 + $0x68] sm:$0xff] }
  0xec   : > { %766 = vmatmul.mubr.bf16.gmra.mxu0 %v2241_v39  ;;  %830 = vmatmul.mubr.bf16.gmra.mxu1 %v2242_v40  ;;  %v362_v39 = vld [vmem:[#allocation2 + $0x90] sm:$0xff] }
  0xed   : > { %773 = vmatprep.mubr.bf16.mxu0 %v2243_v41  ;;  %837 = vmatprep.mubr.bf16.mxu1 %v2245_v42 }
  0xf4   : > { %774 = vmatmul.mubr.bf16.gmra.mxu0 %v2247_v43  ;;  %838 = vmatmul.mubr.bf16.gmra.mxu1 %v2248_v44 }
  0xf5   : > { %781 = vmatprep.mubr.bf16.mxu0 %v2249_v45  ;;  %845 = vmatprep.mubr.bf16.mxu1 %v2251_v46 }
  0xfc   : > { %782 = vmatmul.mubr.bf16.gmra.mxu0 %v2253_v47  ;;  %846 = vmatmul.mubr.bf16.gmra.mxu1 %v2254_v48  ;;  %v347_v47 = vld [vmem:[#allocation2 + $0x30] sm:$0xff] }
 0x184   : > { %v1830_v49 = vpop.f32.mrf.mxu0  ;;  %v1878_v50 = vpop.f32.mrf.mxu1 }
 0x186   : > { %v1831_v52 = vpop.f32.mrf.mxu0  ;;  %v1879_v54 = vpop.f32.mrf.mxu1 }
 0x187   : > { %v1832_v55 = vadd.f32 %v1831_v52, %v1830_v49  ;;  %v1880_v56 = vadd.f32 %v1879_v54, %v1878_v50  ;;  %v363_v49 = vld [vmem:[#allocation2 + $0x70] sm:$0xff] }
 0x188   : > { %v1833_v57 = vpop.f32.mrf.mxu0  ;;  %v1881_v58 = vpop.f32.mrf.mxu1 }
 0x189   : > { %v854_v59 = vadd.f32 %v1832_v55, %v341_v51  ;;  %v870_v60 = vadd.f32 %v1880_v56, %v357_v53 }
 0x18a   : > { %v1834_v62 = vpop.f32.mrf.mxu0  ;;  %v1882_v0 = vpop.f32.mrf.mxu1 }
 0x18b   : > { %886 = vst [vmem:[#allocation2 + $0xb0] sm:$0xff] %v854_v59  ;;  %902 = vst [vmem:[#allocation2 + $0x38] sm:$0xff] %v870_v60  ;;  %v1835_v1 = vadd.f32 %v1834_v62, %v1833_v57  ;;  %v1883_v2 = vadd.f32 %v1882_v0, %v1881_v58  ;;  %v348_v57 = vld [vmem:[#allocation2 + $0x48] sm:$0xff]  ;;  %v364_v59 = vld [vmem:[#allocation2 + $0xc0] sm:$0xff] }
 0x18c   : > { %v1836_v3 = vpop.f32.mrf.mxu0  ;;  %v1884_v4 = vpop.f32.mrf.mxu1 }
 0x18d   : > { %v855_v5 = vadd.f32 %v1835_v1, %v342_v61  ;;  %v871_v6 = vadd.f32 %v1883_v2, %v358_v63 }
 0x18e   : > { %v1837_v8 = vpop.f32.mrf.mxu0  ;;  %v1885_v10 = vpop.f32.mrf.mxu1 }
 0x18f   : > { %887 = vst [vmem:[#allocation2] sm:$0xff] %v855_v5  ;;  %903 = vst [vmem:[#allocation2 + $0x58] sm:$0xff] %v871_v6  ;;  %v1838_v11 = vadd.f32 %v1837_v8, %v1836_v3  ;;  %v1886_v12 = vadd.f32 %v1885_v10, %v1884_v4  ;;  %v349_v3 = vld [vmem:[#allocation2 + $0x80] sm:$0xff]  ;;  %v365_v5 = vld [vmem:[#allocation2 + $0xa8] sm:$0xff] }
 0x190   : > { %v1839_v13 = vpop.f32.mrf.mxu0  ;;  %v1887_v14 = vpop.f32.mrf.mxu1 }
 0x191   : > { %v856_v15 = vadd.f32 %v1838_v11, %v343_v7  ;;  %v872_v16 = vadd.f32 %v1886_v12, %v359_v9 }
 0x192   : > { %v1840_v18 = vpop.f32.mrf.mxu0  ;;  %v1888_v20 = vpop.f32.mrf.mxu1 }
 0x193   : > { %888 = vst [vmem:[#allocation2 + $0xd8] sm:$0xff] %v856_v15  ;;  %904 = vst [vmem:[#allocation2 + $0x40] sm:$0xff] %v872_v16  ;;  %v1841_v21 = vadd.f32 %v1840_v18, %v1839_v13  ;;  %v1889_v22 = vadd.f32 %v1888_v20, %v1887_v14  ;;  %v350_v13 = vld [vmem:[#allocation2 + $0x88] sm:$0xff]  ;;  %v366_v15 = vld [vmem:[#allocation2 + $0xd0] sm:$0xff] }
 0x194   : > { %v1842_v23 = vpop.f32.mrf.mxu0  ;;  %v1890_v24 = vpop.f32.mrf.mxu1 }
 0x195   : > { %v857_v25 = vadd.f32 %v1841_v21, %v344_v17  ;;  %v873_v26 = vadd.f32 %v1889_v22, %v360_v19 }
 0x196   : > { %v1843_v28 = vpop.f32.mrf.mxu0  ;;  %v1891_v30 = vpop.f32.mrf.mxu1 }
 0x197   : > { %889 = vst [vmem:[#allocation2 + $0x18] sm:$0xff] %v857_v25  ;;  %905 = vst [vmem:[#allocation2 + $0xc8] sm:$0xff] %v873_v26  ;;  %v1844_v31 = vadd.f32 %v1843_v28, %v1842_v23  ;;  %v1892_v32 = vadd.f32 %v1891_v30, %v1890_v24  ;;  %v351_v23 = vld [vmem:[#allocation2 + $0xe8] sm:$0xff]  ;;  %v367_v25 = vld [vmem:[#allocation2 + $0x10] sm:$0xff] }
 0x198   : > { %v1845_v33 = vpop.f32.mrf.mxu0  ;;  %v1893_v34 = vpop.f32.mrf.mxu1 }
 0x199   : > { %v858_v35 = vadd.f32 %v1844_v31, %v345_v27  ;;  %v874_v36 = vadd.f32 %v1892_v32, %v361_v29 }
 0x19a   : > { %v1846_v38 = vpop.f32.mrf.mxu0  ;;  %v1894_v40 = vpop.f32.mrf.mxu1 }
 0x19b   : > { %890 = vst [vmem:[#allocation2 + $0x50] sm:$0xff] %v858_v35  ;;  %906 = vst [vmem:[#allocation2 + $0xe0] sm:$0xff] %v874_v36  ;;  %v1847_v41 = vadd.f32 %v1846_v38, %v1845_v33  ;;  %v1895_v42 = vadd.f32 %v1894_v40, %v1893_v34  ;;  %v352_v33 = vld [vmem:[#allocation2 + $0xb8] sm:$0xff]  ;;  %v368_v35 = vld [vmem:[#allocation2 + $0x28] sm:$0xff] }
 0x19c   : > { %v1848_v43 = vpop.f32.mrf.mxu0  ;;  %v1896_v44 = vpop.f32.mrf.mxu1 }
 0x19d   : > { %v859_v45 = vadd.f32 %v1847_v41, %v346_v37  ;;  %v875_v46 = vadd.f32 %v1895_v42, %v362_v39 }
 0x19e   : > { %v1849_v48 = vpop.f32.mrf.mxu0  ;;  %v1897_v50 = vpop.f32.mrf.mxu1 }
 0x19f   : > { %891 = vst [vmem:[#allocation2 + $0x68] sm:$0xff] %v859_v45  ;;  %907 = vst [vmem:[#allocation2 + $0x90] sm:$0xff] %v875_v46  ;;  %v1850_v51 = vadd.f32 %v1849_v48, %v1848_v43  ;;  %v1898_v52 = vadd.f32 %v1897_v50, %v1896_v44  ;;  %v353_v43 = vld [vmem:[#allocation2 + $0x60] sm:$0xff] }
 0x1a0   : > { %v1851_v53 = vpop.f32.mrf.mxu0  ;;  %v1899_v54 = vpop.f32.mrf.mxu1  ;;  %v369_v45 = vld [vmem:[#allocation2 + $0xa0] sm:$0xff] }
 0x1a1   : > { %v860_v55 = vadd.f32 %v1850_v51, %v347_v47  ;;  %v876_v56 = vadd.f32 %v1898_v52, %v363_v49 }
 0x1a2   : > { %v1852_v58 = vpop.f32.mrf.mxu0  ;;  %v1900_v60 = vpop.f32.mrf.mxu1 }
 0x1a3   : > { %892 = vst [vmem:[#allocation2 + $0x30] sm:$0xff] %v860_v55  ;;  %908 = vst [vmem:[#allocation2 + $0x70] sm:$0xff] %v876_v56  ;;  %v1853_v61 = vadd.f32 %v1852_v58, %v1851_v53  ;;  %v1901_v62 = vadd.f32 %v1900_v60, %v1899_v54  ;;  %v354_v53 = vld [vmem:[#allocation2 + $0xf0] sm:$0xff]  ;;  %v370_v55 = vld [vmem:[#allocation2 + $0xf8] sm:$0xff] }
 0x1a4   : > { %v1854_v63 = vpop.f32.mrf.mxu0  ;;  %v1902_v0 = vpop.f32.mrf.mxu1 }
 0x1a5   : > { %v861_v1 = vadd.f32 %v1853_v61, %v348_v57  ;;  %v877_v2 = vadd.f32 %v1901_v62, %v364_v59 }
 0x1a6   : > { %v1855_v4 = vpop.f32.mrf.mxu0  ;;  %v1903_v6 = vpop.f32.mrf.mxu1 }
 0x1a7   : > { %893 = vst [vmem:[#allocation2 + $0x48] sm:$0xff] %v861_v1  ;;  %909 = vst [vmem:[#allocation2 + $0xc0] sm:$0xff] %v877_v2  ;;  %v1856_v7 = vadd.f32 %v1855_v4, %v1854_v63  ;;  %v1904_v8 = vadd.f32 %v1903_v6, %v1902_v0  ;;  %v355_v63 = vld [vmem:[#allocation2 + $0x8] sm:$0xff]  ;;  %v371_v1 = vld [vmem:[#allocation2 + $0x20] sm:$0xff] }
 0x1a8   : > { %v1857_v9 = vpop.f32.mrf.mxu0  ;;  %v1905_v10 = vpop.f32.mrf.mxu1 }
 0x1a9   : > { %v862_v11 = vadd.f32 %v1856_v7, %v349_v3  ;;  %v878_v12 = vadd.f32 %v1904_v8, %v365_v5 }
 0x1aa   : > { %v1858_v14 = vpop.f32.mrf.mxu0  ;;  %v1906_v16 = vpop.f32.mrf.mxu1 }
 0x1ab   : > { %894 = vst [vmem:[#allocation2 + $0x80] sm:$0xff] %v862_v11  ;;  %910 = vst [vmem:[#allocation2 + $0xa8] sm:$0xff] %v878_v12  ;;  %v1859_v17 = vadd.f32 %v1858_v14, %v1857_v9  ;;  %v1907_v18 = vadd.f32 %v1906_v16, %v1905_v10  ;;  %v356_v9 = vld [vmem:[#allocation2 + $0x78] sm:$0xff] }
 0x1ac   : > { %v1860_v19 = vpop.f32.mrf.mxu0  ;;  %v1908_v20 = vpop.f32.mrf.mxu1  ;;  %v372_v11 = vld [vmem:[#allocation2 + $0x98] sm:$0xff] }
 0x1ad   : > { %v863_v21 = vadd.f32 %v1859_v17, %v350_v13  ;;  %v879_v22 = vadd.f32 %v1907_v18, %v366_v15 }
 0x1ae   : > { %v1861_v24 = vpop.f32.mrf.mxu0  ;;  %v1909_v26 = vpop.f32.mrf.mxu1 }
 0x1af   : > { %895 = vst [vmem:[#allocation2 + $0x88] sm:$0xff] %v863_v21  ;;  %911 = vst [vmem:[#allocation2 + $0xd0] sm:$0xff] %v879_v22  ;;  %v1862_v27 = vadd.f32 %v1861_v24, %v1860_v19  ;;  %v1910_v28 = vadd.f32 %v1909_v26, %v1908_v20 }
 0x1b0   : > { %v1863_v29 = vpop.f32.mrf.mxu0  ;;  %v1911_v30 = vpop.f32.mrf.mxu1 }
 0x1b1   : > { %v864_v31 = vadd.f32 %v1862_v27, %v351_v23  ;;  %v880_v32 = vadd.f32 %v1910_v28, %v367_v25 }
 0x1b2   : > { %v1864_v34 = vpop.f32.mrf.mxu0  ;;  %v1912_v36 = vpop.f32.mrf.mxu1 }
 0x1b3   : > { %896 = vst [vmem:[#allocation2 + $0xe8] sm:$0xff] %v864_v31  ;;  %912 = vst [vmem:[#allocation2 + $0x10] sm:$0xff] %v880_v32  ;;  %v1865_v37 = vadd.f32 %v1864_v34, %v1863_v29  ;;  %v1913_v38 = vadd.f32 %v1912_v36, %v1911_v30 }
 0x1b4   : > { %v1866_v39 = vpop.f32.mrf.mxu0  ;;  %v1914_v40 = vpop.f32.mrf.mxu1 }
 0x1b5   : > { %v865_v41 = vadd.f32 %v1865_v37, %v352_v33  ;;  %v881_v42 = vadd.f32 %v1913_v38, %v368_v35 }
 0x1b6   : > { %v1867_v44 = vpop.f32.mrf.mxu0  ;;  %v1915_v46 = vpop.f32.mrf.mxu1 }
 0x1b7   : > { %897 = vst [vmem:[#allocation2 + $0xb8] sm:$0xff] %v865_v41  ;;  %913 = vst [vmem:[#allocation2 + $0x28] sm:$0xff] %v881_v42  ;;  %v1868_v47 = vadd.f32 %v1867_v44, %v1866_v39  ;;  %v1916_v48 = vadd.f32 %v1915_v46, %v1914_v40 }
 0x1b8   : > { %v1869_v49 = vpop.f32.mrf.mxu0  ;;  %v1917_v50 = vpop.f32.mrf.mxu1 }
 0x1b9   : > { %v866_v51 = vadd.f32 %v1868_v47, %v353_v43  ;;  %v882_v52 = vadd.f32 %v1916_v48, %v369_v45 }
 0x1ba   : > { %v1870_v54 = vpop.f32.mrf.mxu0  ;;  %v1918_v56 = vpop.f32.mrf.mxu1 }
 0x1bb   : > { %898 = vst [vmem:[#allocation2 + $0x60] sm:$0xff] %v866_v51  ;;  %914 = vst [vmem:[#allocation2 + $0xa0] sm:$0xff] %v882_v52  ;;  %v1871_v57 = vadd.f32 %v1870_v54, %v1869_v49  ;;  %v1919_v58 = vadd.f32 %v1918_v56, %v1917_v50 }
 0x1bc   : > { %v1872_v59 = vpop.f32.mrf.mxu0  ;;  %v1920_v60 = vpop.f32.mrf.mxu1 }
 0x1bd   : > { %v867_v61 = vadd.f32 %v1871_v57, %v354_v53  ;;  %v883_v62 = vadd.f32 %v1919_v58, %v370_v55 }
 0x1be   : > { %v1873_v0 = vpop.f32.mrf.mxu0  ;;  %v1921_v2 = vpop.f32.mrf.mxu1 }
 0x1bf   : > { %899 = vst [vmem:[#allocation2 + $0xf0] sm:$0xff] %v867_v61  ;;  %915 = vst [vmem:[#allocation2 + $0xf8] sm:$0xff] %v883_v62  ;;  %v1874_v3 = vadd.f32 %v1873_v0, %v1872_v59  ;;  %v1922_v4 = vadd.f32 %v1921_v2, %v1920_v60 }
 0x1c0   : > { %v1875_v5 = vpop.f32.mrf.mxu0  ;;  %v1923_v6 = vpop.f32.mrf.mxu1 }
 0x1c1   : > { %v868_v7 = vadd.f32 %v1874_v3, %v355_v63  ;;  %v884_v8 = vadd.f32 %v1922_v4, %v371_v1 }
 0x1c2   : > { %v1876_v10 = vpop.f32.mrf.mxu0  ;;  %v1924_v12 = vpop.f32.mrf.mxu1 }
 0x1c3   : > { %900 = vst [vmem:[#allocation2 + $0x8] sm:$0xff] %v868_v7  ;;  %916 = vst [vmem:[#allocation2 + $0x20] sm:$0xff] %v884_v8  ;;  %v1877_v13 = vadd.f32 %v1876_v10, %v1875_v5  ;;  %v1925_v14 = vadd.f32 %v1924_v12, %v1923_v6  ;;  %921 = sbr.rel (%p1638_p10) target bundleno = 715 (0x2cb), region = 60 }
 0x1c5   : > { %v869_v15 = vadd.f32 %v1877_v13, %v356_v9  ;;  %v885_v16 = vadd.f32 %v1925_v14, %v372_v11 }
 0x1c7   : > { %901 = vst [vmem:[#allocation2 + $0x78] sm:$0xff] %v869_v15  ;;  %917 = vst [vmem:[#allocation2 + $0x98] sm:$0xff] %v885_v16 }
 0x1c8   : > { %v2255_v17 = vld [vmem:[#allocation9 + $0x38] sm:$0xff]   ;;  %v2256_v18 = vld [vmem:[#allocation9 + $0x30] sm:$0xff]   ;;  %v2257_v19 = vld [vmem:[#allocation9 + $0x28] sm:$0xff]  }
 0x1c9   : > { %1950 = vmatprep.subr.bf16.mxu0 %v2255_v17  ;;  %2014 = vmatprep.subr.bf16.mxu1 %v2255_v17  ;;  %v2258_v20 = vld [vmem:[#allocation9 + $0x20] sm:$0xff]   ;;  %v922_v21 = vld [vmem:[#allocation2 + $0xb0] sm:$0xff]  ;;  %v2862_v23 = vld [vmem:[#allocation8] ss:$0 sm:$0xff] }
 0x1ca   : > { %1951 = vmatpush3.bf16.msra.mxu0 %v2255_v17  ;;  %2022 = vmatpush3.bf16.msra.mxu1 %v2255_v17  ;;  %v923_v22 = vld [vmem:[#allocation2] sm:$0xff]  ;;  %v961_v24 = vadd.f32 %v2862_v23, %v922_v21  ;;  %v938_v26 = vld [vmem:[#allocation2 + $0x38] sm:$0xff]  ;;  %v941_v41 = vld [vmem:[#allocation2 + $0xc8] sm:$0xff] }
 0x1cb   : > { %1952 = vmatprep.subr.bf16.mxu0 %v2256_v18  ;;  %2015 = vmatprep.subr.bf16.mxu1 %v2256_v18  ;;  %v962_v25 = vadd.f32 %v2862_v23, %v923_v22  ;;  %v939_v27 = vld [vmem:[#allocation2 + $0x58] sm:$0xff]  ;;  %v977_v28 = vadd.f32 %v2862_v23, %v938_v26  ;;  %v940_v40 = vld [vmem:[#allocation2 + $0x40] sm:$0xff]  ;;  %v926_v42 = vld [vmem:[#allocation2 + $0x50] sm:$0xff]  ;;  %v980_v50 = vadd.f32 %v2862_v23, %v941_v41 }
 0x1cc   : > { %v978_v29 = vadd.f32 %v2862_v23, %v939_v27  ;;  %v993_v30 = vmax.f32 %v961_v24, 0.0  ;;  %v2259_v32 = vld [vmem:[#allocation9 + $0x18] sm:$0xff]   ;;  %v2260_v37 = vld [vmem:[#allocation9 + $0x10] sm:$0xff]   ;;  %v927_v43 = vld [vmem:[#allocation2 + $0x68] sm:$0xff]  ;;  %v979_v49 = vadd.f32 %v2862_v23, %v940_v40  ;;  %v965_v51 = vadd.f32 %v2862_v23, %v926_v42 }
 0x1cd   : > { %v994_v31 = vmax.f32 %v962_v25, 0.0  ;;  %v1009_v33 = vmax.f32 %v977_v28, 0.0  ;;  %v924_v38 = vld [vmem:[#allocation2 + $0xd8] sm:$0xff]  ;;  %v2261_v44 = vld [vmem:[#allocation9 + $0x8] sm:$0xff]   ;;  %v942_v47 = vld [vmem:[#allocation2 + $0xe0] sm:$0xff]  ;;  %v966_v52 = vadd.f32 %v2862_v23, %v927_v43  ;;  %v1012_v59 = vmax.f32 %v980_v50, 0.0 }
 0x1ce   : > { %1953 = vmatpush3.bf16.msra.mxu0 %v2256_v18  ;;  %2023 = vmatpush3.bf16.msra.mxu1 %v2256_v18  ;;  %v1010_v34 = vmax.f32 %v978_v29, 0.0  ;;  %v925_v39 = vld [vmem:[#allocation2 + $0x18] sm:$0xff]  ;;  %v963_v45 = vadd.f32 %v2862_v23, %v924_v38  ;;  %v943_v48 = vld [vmem:[#allocation2 + $0x90] sm:$0xff]  ;;  %v981_v53 = vadd.f32 %v2862_v23, %v942_v47  ;;  %v2262_v55 = vld [vmem:[#allocation9] sm:$0xff]   ;;  %v1011_v58 = vmax.f32 %v979_v49, 0.0 }
 0x1cf   : > { %1954 = vmatprep.subr.bf16.mxu0 %v2257_v19  ;;  %2016 = vmatprep.subr.bf16.mxu1 %v2257_v19  ;;  %v1025_v35 = vpack.c.bf16 %v994_v31, %v993_v30  ;;  %v964_v46 = vadd.f32 %v2862_v23, %v925_v39  ;;  %v982_v54 = vadd.f32 %v2862_v23, %v943_v48  ;;  %v997_v60 = vmax.f32 %v965_v51, 0.0  ;;  %v928_v62 = vld [vmem:[#allocation2 + $0x30] sm:$0xff]  ;;  %v929_v63 = vld [vmem:[#allocation2 + $0x48] sm:$0xff]  ;;  %v945_v3 = vld [vmem:[#allocation2 + $0xc0] sm:$0xff] }
 0x1d0   : > { %v1033_v36 = vpack.c.bf16 %v1010_v34, %v1009_v33  ;;  %v995_v56 = vmax.f32 %v963_v45, 0.0  ;;  %v998_v61 = vmax.f32 %v966_v52, 0.0  ;;  %v944_v0 = vld [vmem:[#allocation2 + $0x70] sm:$0xff]  ;;  %v1013_v1 = vmax.f32 %v981_v53, 0.0  ;;  %v930_v4 = vld [vmem:[#allocation2 + $0x80] sm:$0xff]  ;;  %v931_v5 = vld [vmem:[#allocation2 + $0x88] sm:$0xff] }
 0x1d1   : > { %1966 = vmatprep.mubr.bf16.mxu0 %v1025_v35  ;;  %v996_v57 = vmax.f32 %v964_v46, 0.0  ;;  %v1014_v2 = vmax.f32 %v982_v54, 0.0  ;;  %v946_v7 = vld [vmem:[#allocation2 + $0xa8] sm:$0xff]  ;;  %v947_v8 = vld [vmem:[#allocation2 + $0xd0] sm:$0xff]  ;;  %v1034_v9 = vpack.c.bf16 %v1012_v59, %v1011_v58  ;;  %v967_v10 = vadd.f32 %v2862_v23, %v928_v62  ;;  %v933_v24 = vld [vmem:[#allocation2 + $0xb8] sm:$0xff] }
 0x1d2   : > { %1955 = vmatpush3.bf16.msra.mxu0 %v2257_v19  ;;  %2024 = vmatpush3.bf16.msra.mxu1 %v2257_v19  ;;  %v968_v11 = vadd.f32 %v2862_v23, %v929_v63  ;;  %v983_v12 = vadd.f32 %v2862_v23, %v944_v0  ;;  %v1027_v13 = vpack.c.bf16 %v998_v61, %v997_v60  ;;  %v932_v22 = vld [vmem:[#allocation2 + $0xe8] sm:$0xff]  ;;  %v948_v29 = vld [vmem:[#allocation2 + $0x10] sm:$0xff]  ;;  %v934_v33 = vld [vmem:[#allocation2 + $0x60] sm:$0xff] }
 0x1d3   : > { %1956 = vmatprep.subr.bf16.mxu0 %v2258_v20  ;;  %2017 = vmatprep.subr.bf16.mxu1 %v2258_v20  ;;  %v1026_v6 = vpack.c.bf16 %v996_v57, %v995_v56  ;;  %v984_v14 = vadd.f32 %v2862_v23, %v945_v3  ;;  %v969_v15 = vadd.f32 %v2862_v23, %v930_v4  ;;  %v949_v30 = vld [vmem:[#allocation2 + $0x28] sm:$0xff]  ;;  %v935_v34 = vld [vmem:[#allocation2 + $0xf0] sm:$0xff]  ;;  %v950_v35 = vld [vmem:[#allocation2 + $0xa0] sm:$0xff] }
 0x1d4   : > { %1982 = vmatprep.mubr.bf16.mxu1 %v1033_v36  ;;  %v970_v16 = vadd.f32 %v2862_v23, %v931_v5  ;;  %v1035_v17 = vpack.c.bf16 %v1014_v2, %v1013_v1  ;;  %v985_v18 = vadd.f32 %v2862_v23, %v946_v7  ;;  %v986_v19 = vadd.f32 %v2862_v23, %v947_v8  ;;  %v951_v36 = vld [vmem:[#allocation2 + $0xf8] sm:$0xff]  ;;  %v936_v53 = vld [vmem:[#allocation2 + $0x8] sm:$0xff]  ;;  %v952_v59 = vld [vmem:[#allocation2 + $0x20] sm:$0xff] }
 0x1d5   : > { %v1000_v21 = vmax.f32 %v968_v11, 0.0  ;;  %v1015_v25 = vmax.f32 %v983_v12, 0.0  ;;  %v1016_v26 = vmax.f32 %v984_v14, 0.0  ;;  %v1001_v27 = vmax.f32 %v969_v15, 0.0  ;;  %v937_v54 = vld [vmem:[#allocation2 + $0x78] sm:$0xff] }
 0x1d6   : > { %1957 = vmatpush3.bf16.msra.mxu0 %v2258_v20  ;;  %2025 = vmatpush3.bf16.msra.mxu1 %v2258_v20  ;;  %v999_v20 = vmax.f32 %v967_v10, 0.0  ;;  %v1002_v28 = vmax.f32 %v970_v16, 0.0  ;;  %v1017_v31 = vmax.f32 %v985_v18, 0.0  ;;  %v972_v38 = vadd.f32 %v2862_v23, %v933_v24  ;;  %v953_v60 = vld [vmem:[#allocation2 + $0x98] sm:$0xff] }
 0x1d7   : > { %1958 = vmatprep.subr.bf16.mxu0 %v2259_v32  ;;  %2018 = vmatprep.subr.bf16.mxu1 %v2259_v32  ;;  %v987_v39 = vadd.f32 %v2862_v23, %v948_v29  ;;  %v988_v40 = vadd.f32 %v2862_v23, %v949_v30  ;;  %v1036_v42 = vpack.c.bf16 %v1016_v26, %v1015_v25 }
 0x1d8   : > { %v1028_v41 = vpack.c.bf16 %v1000_v21, %v999_v20  ;;  %v1029_v43 = vpack.c.bf16 %v1002_v28, %v1001_v27  ;;  %v974_v46 = vadd.f32 %v2862_v23, %v935_v34  ;;  %v989_v47 = vadd.f32 %v2862_v23, %v950_v35 }
 0x1d9   : > { %v990_v48 = vadd.f32 %v2862_v23, %v951_v36  ;;  %v1004_v50 = vmax.f32 %v972_v38, 0.0  ;;  %v1019_v51 = vmax.f32 %v987_v39, 0.0  ;;  %v1020_v52 = vmax.f32 %v988_v40, 0.0 }
 0x1da   : > { %1959 = vmatpush3.bf16.msra.mxu0 %v2259_v32  ;;  %2026 = vmatpush3.bf16.msra.mxu1 %v2259_v32  ;;  %v1018_v32 = vmax.f32 %v986_v19, 0.0  ;;  %v1006_v56 = vmax.f32 %v974_v46, 0.0  ;;  %v1021_v57 = vmax.f32 %v989_v47, 0.0  ;;  %v975_v63 = vadd.f32 %v2862_v23, %v936_v53 }
 0x1db   : > { %1960 = vmatprep.subr.bf16.mxu0 %v2260_v37  ;;  %2019 = vmatprep.subr.bf16.mxu1 %v2260_v37  ;;  %v1022_v58 = vmax.f32 %v990_v48, 0.0  ;;  %v1038_v62 = vpack.c.bf16 %v1020_v52, %v1019_v51  ;;  %v976_v0 = vadd.f32 %v2862_v23, %v937_v54  ;;  %v991_v1 = vadd.f32 %v2862_v23, %v952_v59 }
 0x1dc   : > { %v1037_v45 = vpack.c.bf16 %v1018_v32, %v1017_v31  ;;  %v992_v2 = vadd.f32 %v2862_v23, %v953_v60  ;;  %v1007_v5 = vmax.f32 %v975_v63, 0.0 }
 0x1dd   : > { %v1039_v4 = vpack.c.bf16 %v1022_v58, %v1021_v57  ;;  %v1023_v7 = vmax.f32 %v991_v1, 0.0 }
 0x1de   : > { %1961 = vmatpush3.bf16.msra.mxu0 %v2260_v37  ;;  %2027 = vmatpush3.bf16.msra.mxu1 %v2260_v37  ;;  %v971_v37 = vadd.f32 %v2862_v23, %v932_v22  ;;  %v1024_v8 = vmax.f32 %v992_v2, 0.0 }
 0x1df   : > { %1962 = vmatprep.subr.bf16.mxu0 %v2261_v44  ;;  %2020 = vmatprep.subr.bf16.mxu1 %v2261_v44 }
 0x1e0   : > { %v1003_v49 = vmax.f32 %v971_v37, 0.0  ;;  %v1040_v10 = vpack.c.bf16 %v1024_v8, %v1023_v7 }
 0x1e2   : > { %1963 = vmatpush3.bf16.msra.mxu0 %v2261_v44  ;;  %2028 = vmatpush3.bf16.msra.mxu1 %v2261_v44  ;;  %v973_v44 = vadd.f32 %v2862_v23, %v934_v33  ;;  %v1030_v61 = vpack.c.bf16 %v1004_v50, %v1003_v49 }
 0x1e3   : > { %1964 = vmatprep.subr.bf16.mxu0 %v2262_v55  ;;  %2021 = vmatprep.subr.bf16.mxu1 %v2262_v55 }
 0x1e6   : > { %1965 = vmatpush3.bf16.msra.mxu0 %v2262_v55  ;;  %2029 = vmatpush3.bf16.msra.mxu1 %v2262_v55  ;;  %v1005_v55 = vmax.f32 %v973_v44, 0.0 }
 0x1e8   : > { %v1031_v3 = vpack.c.bf16 %v1006_v56, %v1005_v55 }
 0x1e9   : > { %1967 = vmatmul.mubr.bf16.vlgmr.msra.gmra.mxu0 %v1026_v6  ;;  %1983 = vmatmul.mubr.bf16.vlgmr.msra.gmra.mxu1 %v1034_v9  ;;  %v1008_v6 = vmax.f32 %v976_v0, 0.0 }
 0x1ea   : > { %1970 = vmatprep.mubr.bf16.mxu0 %v1027_v13  ;;  %1986 = vmatprep.mubr.bf16.mxu1 %v1035_v17 }
 0x1eb   : > { %v1032_v9 = vpack.c.bf16 %v1008_v6, %v1007_v5 }
 0x1f1   : > { %1971 = vmatmul.mubr.bf16.gmra.mxu0 %v1028_v41  ;;  %1987 = vmatmul.mubr.bf16.gmra.mxu1 %v1036_v42 }
 0x1f2   : > { %1974 = vmatprep.mubr.bf16.mxu0 %v1029_v43  ;;  %1990 = vmatprep.mubr.bf16.mxu1 %v1037_v45 }
 0x1f9   : > { %1975 = vmatmul.mubr.bf16.gmra.mxu0 %v1030_v61  ;;  %1991 = vmatmul.mubr.bf16.gmra.mxu1 %v1038_v62 }
 0x1fa   : > { %1978 = vmatprep.mubr.bf16.mxu0 %v1031_v3  ;;  %1994 = vmatprep.mubr.bf16.mxu1 %v1039_v4 }
 0x201   : > { %1979 = vmatmul.mubr.bf16.gmra.mxu0 %v1032_v9  ;;  %1995 = vmatmul.mubr.bf16.gmra.mxu1 %v1040_v10 }
 0x2a9   : > { %v1968_v11 = vpop.f32.mrf.mxu0  ;;  %v1984_v12 = vpop.f32.mrf.mxu1 }
 0x2ab   : > { %v1139_v23 = vpop.f32.mrf.mxu0  ;;  %v1203_v13 = vpop.f32.mrf.mxu1 }
 0x2ad   : > { %v1969_v14 = vpop.f32.mrf.mxu0  ;;  %v1985_v15 = vpop.f32.mrf.mxu1 }
 0x2ae   : > { %v1727_v16 = vpack.c.bf16 %v1969_v14, %v1968_v11  ;;  %v1767_v17 = vpack.c.bf16 %v1985_v15, %v1984_v12 }
 0x2af   : > { %v1142_v18 = vpop.f32.mrf.mxu0  ;;  %v1206_v19 = vpop.f32.mrf.mxu1 }
 0x2b0   : > { %1799 = vst [vmem:[%s2810_s9 + $0x8] sm:$0xff] %v1727_v16   ;;  %1807 = vst [vmem:[%s2810_s9 + $0x48] sm:$0xff] %v1767_v17   ;;  %v1722_v20 = vpack.c.bf16 %v1142_v18, %v1139_v23  ;;  %v1762_v21 = vpack.c.bf16 %v1206_v19, %v1203_v13 }
 0x2b1   : > { %v1972_v22 = vpop.f32.mrf.mxu0  ;;  %v1988_v24 = vpop.f32.mrf.mxu1 }
 0x2b2   : > { %1723 = vst [vmem:[%s2810_s9] sm:$0xff] %v1722_v20   ;;  %1806 = vst [vmem:[%s2810_s9 + $0x40] sm:$0xff] %v1762_v21  }
 0x2b3   : > { %v1155_v25 = vpop.f32.mrf.mxu0  ;;  %v1219_v26 = vpop.f32.mrf.mxu1 }
 0x2b5   : > { %v1973_v27 = vpop.f32.mrf.mxu0  ;;  %v1989_v28 = vpop.f32.mrf.mxu1 }
 0x2b6   : > { %v1737_v29 = vpack.c.bf16 %v1973_v27, %v1972_v22  ;;  %v1777_v30 = vpack.c.bf16 %v1989_v28, %v1988_v24 }
 0x2b7   : > { %v1158_v31 = vpop.f32.mrf.mxu0  ;;  %v1222_v32 = vpop.f32.mrf.mxu1 }
 0x2b8   : > { %1801 = vst [vmem:[%s2810_s9 + $0x18] sm:$0xff] %v1737_v29   ;;  %1809 = vst [vmem:[%s2810_s9 + $0x58] sm:$0xff] %v1777_v30   ;;  %v1732_v33 = vpack.c.bf16 %v1158_v31, %v1155_v25  ;;  %v1772_v34 = vpack.c.bf16 %v1222_v32, %v1219_v26 }
 0x2b9   : > { %v1976_v35 = vpop.f32.mrf.mxu0  ;;  %v1992_v36 = vpop.f32.mrf.mxu1 }
 0x2ba   : > { %1800 = vst [vmem:[%s2810_s9 + $0x10] sm:$0xff] %v1732_v33   ;;  %1808 = vst [vmem:[%s2810_s9 + $0x50] sm:$0xff] %v1772_v34  }
 0x2bb   : > { %v1171_v37 = vpop.f32.mrf.mxu0  ;;  %v1235_v38 = vpop.f32.mrf.mxu1 }
 0x2bd   : > { %v1977_v39 = vpop.f32.mrf.mxu0  ;;  %v1993_v40 = vpop.f32.mrf.mxu1 }
 0x2be   : > { %v1747_v41 = vpack.c.bf16 %v1977_v39, %v1976_v35  ;;  %v1787_v42 = vpack.c.bf16 %v1993_v40, %v1992_v36 }
 0x2bf   : > { %v1174_v43 = vpop.f32.mrf.mxu0  ;;  %v1238_v44 = vpop.f32.mrf.mxu1 }
 0x2c0   : > { %1803 = vst [vmem:[%s2810_s9 + $0x28] sm:$0xff] %v1747_v41   ;;  %1811 = vst [vmem:[%s2810_s9 + $0x68] sm:$0xff] %v1787_v42   ;;  %v1742_v45 = vpack.c.bf16 %v1174_v43, %v1171_v37  ;;  %v1782_v46 = vpack.c.bf16 %v1238_v44, %v1235_v38 }
 0x2c1   : > { %v1980_v47 = vpop.f32.mrf.mxu0  ;;  %v1996_v48 = vpop.f32.mrf.mxu1 }
 0x2c2   : > { %1802 = vst [vmem:[%s2810_s9 + $0x20] sm:$0xff] %v1742_v45   ;;  %1810 = vst [vmem:[%s2810_s9 + $0x60] sm:$0xff] %v1782_v46  }
 0x2c3   : > { %v1187_v49 = vpop.f32.mrf.mxu0  ;;  %v1251_v50 = vpop.f32.mrf.mxu1 }
 0x2c5   : > { %v1981_v51 = vpop.f32.mrf.mxu0  ;;  %v1997_v52 = vpop.f32.mrf.mxu1 }
 0x2c6   : > { %v1757_v53 = vpack.c.bf16 %v1981_v51, %v1980_v47  ;;  %v1797_v54 = vpack.c.bf16 %v1997_v52, %v1996_v48 }
 0x2c7   : > { %v1190_v55 = vpop.f32.mrf.mxu0  ;;  %v1254_v56 = vpop.f32.mrf.mxu1 }
 0x2c8   : > { %1805 = vst [vmem:[%s2810_s9 + $0x38] sm:$0xff] %v1757_v53   ;;  %1813 = vst [vmem:[%s2810_s9 + $0x78] sm:$0xff] %v1797_v54   ;;  %v1752_v57 = vpack.c.bf16 %v1190_v55, %v1187_v49  ;;  %v1792_v58 = vpack.c.bf16 %v1254_v56, %v1251_v50 }
 0x2ca   : > { %1804 = vst [vmem:[%s2810_s9 + $0x30] sm:$0xff] %v1752_v57   ;;  %1812 = vst [vmem:[%s2810_s9 + $0x70] sm:$0xff] %v1792_v58  }
 0x2cb PF: > { %s3059_s18 = sld [smem:[#allocation20_spill]]  ;;  %s1440_s2 = sshll.u32 %s2810_s9, 4  ;;  %s2919_s2 = int_to_ptr.vmem [resolvable:$true] %s1440_s2 }
 0x2cc   : > { %s3061_s3 = sld [smem:[#allocation22_spill]]  ;;  %s2923_s8 = scalar_lea.sflag [#allocation5], %s297_s24 }
 0x2cd   : > { %s3062_s13 = sld [smem:[#allocation30_spill]]  ;;  %s2371_s27 = scalar_lea.vmem %s2919_s2, 2048 }
 0x2ce   : > { %p2372_p0 = scmp.ne.s32.totalorder %s2919_s2, %s2371_s27  ;;  %s2539_s0 = smov [#allocation11]  }
 0x2cf   : > { %s2375_s14 = sshll.u32 %s2539_s0, 4  ;;  %s2376_s14 = int_to_ptr.vmem [resolvable:$false] %s2375_s14 }
 0x2d0   : > { %s2377_s10 = scalar_lea.vmem %s2376_s14, 4096  ;;  %p2378_p1 = scmp.lt.s32.totalorder %s2919_s2, %s2376_s14 }
 0x2d1   : > { %s1718_s4 = sshll.u32 %s3059_s18, 11  ;;  %p2379_p3 = scmp.lt.s32.totalorder %s2377_s10, %s2371_s27 }
 0x2d2   : > { %p3063_p6 = scmp.ne.s32.totalorder %s3061_s3, 0 }
 0x2d3   : > { %s2916_s12 = scalar_lea.hbm %s3062_s13, %s1718_s4  ;;  %p2380_p9 = por %p2379_p3, %p2378_p1 }
 0x2d4   : > { %p2373_p2 = pnand %p2372_p0, %p3063_p6 }
 0x2d6   : > { %p2374_p7 = pneg %p2373_p2 }
 0x2d8   : > { %p2381_p11 = pnand %p2380_p9, %p2374_p7 }
 0x2da   : > { %2384 = shalt.err (!%p2381_p11)
}
 0x2db   : > { %s2385_s30 = scalar_lea.hbm %s2916_s12, 2048  ;;  %s2389_s25 = scalar_lea.hbm %s3062_s13, 6144 }
 0x2dc   : > { %p2386_p4 = scmp.ne.s32.totalorder %s2916_s12, %s2385_s30  ;;  %p2390_p13 = scmp.lt.s32.totalorder %s2916_s12, %s3062_s13 }
 0x2dd   : > { %p2391_p5 = scmp.lt.s32.totalorder %s2389_s25, %s2385_s30 }
 0x2de   : > { %p2387_p8 = pnand %p2386_p4, %p3063_p6 }
 0x2df   : > { %p2392_p10 = por %p2391_p5, %p2390_p13 }
 0x2e0   : > { %p2388_p12 = pneg %p2387_p8 }
 0x2e2   : > { %p2393_p0 = pnand %p2392_p10, %p2388_p12 }
 0x2e4   : > { %2396 = shalt.err (!%p2393_p0)
}
 0x2e5   : > { %s2540_s29 = smov 64   ;;  %s2541_s18 = smov 4  }
 0x2e6   : > { %2043 = dma.vmem_to_hbm [thread:$0]  (%p3063_p6), %s2919_s2, 2048, %s2916_s12, %s2923_s8, %s2540_s29, %s2540_s29, %s2541_s18  }
 0x2e7 PF: > { %s3064_s11 = sld [smem:[#allocation17_spill]]  ;;  %p2068_p2 = scmp.ge.s32.totalorder %s2527_s28, 2 }
 0x2e8   : > { %s3065_s4 = sld [smem:[#allocation23_spill]] }
 0x2ed   : > { %s1455_s16 = sand.u32 1, %s3064_s11  }
 0x2ee   : > { %p3066_p7 = scmp.ne.s32.totalorder %s3065_s4, 0  ;;  %s1456_s5 = scalar_lea.sflag [#allocation5], %s1455_s16 }
 0x2f0   : > { %p2060_p1 = pnand %p2068_p2, %p3066_p7 }
 0x2f2   : > { %p2061_p3 = pneg %p2060_p1 }
 0x2f4   : > { %2470 = dma.done.wait (%p2061_p3), %s1456_s5, 2048  }
 0x2f5   : > { %2472 = vsyncadd (%p2061_p3), %s1456_s5, 4294965248  ;;  %s24_s28 = sadd.s32 1, %s2527_s28   ;;  %s3068_s3 = sld [smem:[#allocation18_spill]] }
 0x2f6   : > { %p2951_p9 = scmp.ge.s32.totalorder %s24_s28, 11   ;;  %s3069_s12 = sld [smem:[#allocation26_spill]] }
 0x2f7   : > { %s3070_s2 = smov %s2735_s15  ;;  %s3071_s25 = sld [smem:[#allocation21_spill]] }
 0x2f8   : > { %s3072_s8 = sld [smem:[#allocation24_spill]]  ;;  %s3076_s16 = smov %s2483_s17 }
 0x2f9   : > { %s3073_s0 = sld [smem:[#allocation25_spill]]  ;;  %s3078_s18 = smov %s2491_s19 }
 0x2fa   : > { %s3079_s19 = smov %s2495_s20  ;;  %s3080_s20 = smov %s2760_s21 }
 0x2fb   : > { %s3075_s15 = smov %s3068_s3  ;;  %s3081_s21 = smov %s2503_s22 }
 0x2fc   : > { %s3077_s17 = smov %s3069_s12  ;;  %s3082_s22 = smov %s2507_s23 }
 0x2fd   : > { %s3083_s23 = smov %s3070_s2  ;;  %s3084_s24 = smov %s2519_s26 }
 0x2fe   : > { %s3085_s26 = smov %s3072_s8  ;;  %23 = sbr.rel (!%p2951_p9) target bundleno = 18 (0x12), region = 110 }
 0x2ff   : > { %s3086_s27 = smov %s3073_s0 }
 0x303   :  { %1461 = vsyncpa [#allocation4], 1 }
 0x304   :  { %1463 = vsyncpa [#allocation4 + $0x1], 1 }
 0x305   :  { %1464 = vsyncpa [#allocation7], 1 }
 0x306   :  { %1466 = vsyncpa [#allocation7 + $0x1], 1 }
 0x307   :  { %1467 = vsyncpa [#allocation10], 1 }
 0x308   :  { %1468 = vsyncpa [#allocation5], 1 }
 0x309   :  { %1470 = vsyncpa [#allocation5 + $0x1], 1 }

</bundles_post_ra>
